<compile_context>
chip_gen: v6e
topology: v6e:2x2x1
jax: 0.10.0
libtpu: 0.0.40
codegen_flags: <defaults>
</compile_context>

<pallas_src>
import math

import jax
import jax.numpy as jnp
from jax.experimental import pallas as pl
from jax.experimental.pallas import tpu as pltpu


def ffn_kernel(x_ref, w1_ref, b1_ref, w2_ref, b2_ref, o_ref):
    # x_ref: (Tm, D) f32 | w1_ref: (D, F) bf16 | b1_ref: (1, F) f32
    # w2_ref: (F, D) bf16 | b2_ref: (1, D) f32 | o_ref: (Tm, D)
    x = x_ref[...]

    # hidden = relu(x @ W1 + b1)   — bf16 operands, f32 accumulate
    h = jnp.dot(x.astype(jnp.bfloat16), w1_ref[...],
                preferred_element_type=jnp.float32)
    h = jnp.maximum(h + b1_ref[...], 0.0)

    # out = hidden @ W2 + b2
    y = jnp.dot(h.astype(jnp.bfloat16), w2_ref[...],
                preferred_element_type=jnp.float32)
    o_ref[...] = (y + b2_ref[...]).astype(o_ref.dtype)


def feed_forward_pallas(x, w1, b1, w2, b2, *, row_tile=None):
    """y = relu(x @ w1 + b1) @ w2 + b2, matching nn.Linear->ReLU->nn.Linear.

    x:  (..., D) float32
    w1: (D, F), b1: (F,)   -- i.e. torch W1.weight.T / W1.bias
    w2: (F, D), b2: (D,)   -- i.e. torch W2.weight.T / W2.bias
    """
    orig_shape = x.shape
    D = orig_shape[-1]
    F = w1.shape[1]
    x2d = x.reshape(-1, D)
    M = x2d.shape[0]

    if row_tile is None:
        row_tile = M
        for t in (512, 256, 128, 64, 32, 16, 8):
            if M % t == 0:
                row_tile = t
                break
    assert M % row_tile == 0

    out2d = pl.pallas_call(
        ffn_kernel,
        out_shape=jax.ShapeDtypeStruct((M, D), x.dtype),
        grid=(M // row_tile,),
        in_specs=[
            pl.BlockSpec((row_tile, D), lambda i: (i, 0)),   # activations (streamed)
            pl.BlockSpec((D, F), lambda i: (0, 0)),          # W1 (bf16, resident)
            pl.BlockSpec((1, F), lambda i: (0, 0)),          # b1
            pl.BlockSpec((F, D), lambda i: (0, 0)),          # W2 (bf16, resident)
            pl.BlockSpec((1, D), lambda i: (0, 0)),          # b2
        ],
        out_specs=pl.BlockSpec((row_tile, D), lambda i: (i, 0)),
        compiler_params=pltpu.CompilerParams(
            dimension_semantics=("parallel",),
            vmem_limit_bytes=64 * 1024 * 1024),
    )(
        x2d,
        w1.astype(jnp.bfloat16),
        b1.reshape(1, F).astype(jnp.float32),
        w2.astype(jnp.bfloat16),
        b2.reshape(1, D).astype(jnp.float32),
    )
    return out2d.reshape(orig_shape)


def feed_forward_ref(x, w1, b1, w2, b2):
    """Pure-JAX f32 reference mirroring the PyTorch forward."""
    h = jnp.maximum(x @ w1 + b1, 0.0)
    return h @ w2 + b2


def init_params(key, D, F):
    # nn.Linear default init: U(-1/sqrt(fan_in), 1/sqrt(fan_in)) for weight and bias.
    ks = jax.random.split(key, 4)
    s1 = 1.0 / math.sqrt(D)
    s2 = 1.0 / math.sqrt(F)
    w1 = jax.random.uniform(ks[0], (D, F), jnp.float32, -s1, s1)   # = W1.weight.T
    b1 = jax.random.uniform(ks[1], (F,), jnp.float32, -s1, s1)
    w2 = jax.random.uniform(ks[2], (F, D), jnp.float32, -s2, s2)   # = W2.weight.T
    b2 = jax.random.uniform(ks[3], (D,), jnp.float32, -s2, s2)
    return w1, b1, w2, b2


if __name__ == "__main__":
    # embedding_dim=128 / ff_hidden_dim=512 are the KP-AGNN-ICAM model defaults;
    # batch=2, seq=64 keeps the test small (M = 128 rows) while staying lane-dense.
    B, N, D, F = 2, 64, 128, 512

    key = jax.random.PRNGKey(0)
    k_x, k_p = jax.random.split(key)
    x = jax.random.normal(k_x, (B, N, D), jnp.float32)
    w1, b1, w2, b2 = init_params(k_p, D, F)

    out = feed_forward_pallas(x, w1, b1, w2, b2)
    out = jax.block_until_ready(out)

    ref = feed_forward_ref(x, w1, b1, w2, b2)
    assert out.shape == (B, N, D)
    max_err = float(jnp.max(jnp.abs(out - ref)))
    assert jnp.allclose(out, ref, rtol=2e-2, atol=2e-2), max_err

    print("KERNEL_OK")
</pallas_src>

<mosaic_0001>
module attributes {stable_mosaic.version = 11 : i64} {
  func.func @ffn_kernel(%arg0: i32, %arg1: memref<128x128xf32, #tpu.memory_space<vmem>>, %arg2: memref<128x512xbf16, #tpu.memory_space<vmem>>, %arg3: memref<1x512xf32, #tpu.memory_space<vmem>>, %arg4: memref<512x128xbf16, #tpu.memory_space<vmem>>, %arg5: memref<1x128xf32, #tpu.memory_space<vmem>>, %arg6: memref<128x128xf32, #tpu.memory_space<vmem>>) attributes {dimension_semantics = [#tpu.dimension_semantics<parallel>], iteration_bounds = array<i64: 1>, scalar_prefetch = 0 : i64, scratch_operands = 0 : i64, tpu.core_type = #tpu.core_type<tc>, window_params = [{transform_indices = @transform_0, window_bounds = array<i64: 128, 128>}, {pipeline_mode = #tpu.pipeline_mode<synchronous>, transform_indices = @transform_1, window_bounds = array<i64: 128, 512>}, {pipeline_mode = #tpu.pipeline_mode<synchronous>, transform_indices = @transform_2, window_bounds = array<i64: 1, 512>}, {pipeline_mode = #tpu.pipeline_mode<synchronous>, transform_indices = @transform_3, window_bounds = array<i64: 512, 128>}, {pipeline_mode = #tpu.pipeline_mode<synchronous>, transform_indices = @transform_4, window_bounds = array<i64: 1, 128>}, {transform_indices = @transform_5, window_bounds = array<i64: 128, 128>}]} {
    %c0 = arith.constant 0 : index
    %c0_0 = arith.constant 0 : index
    %0 = vector.load %arg1[%c0, %c0_0] : memref<128x128xf32, #tpu.memory_space<vmem>>, vector<128x128xf32>
    %1 = arith.truncf %0 : vector<128x128xf32> to vector<128x128xbf16>
    %c0_1 = arith.constant 0 : index
    %c0_2 = arith.constant 0 : index
    %2 = vector.load %arg2[%c0_1, %c0_2] : memref<128x512xbf16, #tpu.memory_space<vmem>>, vector<128x512xbf16>
    %cst = arith.constant dense<0.000000e+00> : vector<128x512xf32>
    %3 = tpu.matmul %1, %2, %cst {dimension_numbers = #tpu.dot_dimension_numbers<[1], [0], [0], [1], [0, 0, 1, 1], [], []>} : vector<128x128xbf16>, vector<128x512xbf16>, vector<128x512xf32> -> vector<128x512xf32>
    %c0_3 = arith.constant 0 : index
    %c0_4 = arith.constant 0 : index
    %4 = vector.load %arg3[%c0_3, %c0_4] : memref<1x512xf32, #tpu.memory_space<vmem>>, vector<1x512xf32>
    %5 = vector.broadcast %4 : vector<1x512xf32> to vector<128x512xf32>
    %6 = arith.addf %3, %5 : vector<128x512xf32>
    %cst_5 = arith.constant 0.000000e+00 : f32
    %7 = vector.broadcast %cst_5 : f32 to vector<128x512xf32>
    %8 = arith.maximumf %6, %7 : vector<128x512xf32>
    %9 = arith.truncf %8 : vector<128x512xf32> to vector<128x512xbf16>
    %c0_6 = arith.constant 0 : index
    %c0_7 = arith.constant 0 : index
    %10 = vector.load %arg4[%c0_6, %c0_7] : memref<512x128xbf16, #tpu.memory_space<vmem>>, vector<512x128xbf16>
    %cst_8 = arith.constant dense<0.000000e+00> : vector<128x128xf32>
    %11 = tpu.matmul %9, %10, %cst_8 {dimension_numbers = #tpu.dot_dimension_numbers<[1], [0], [0], [1], [0, 0, 1, 1], [], []>} : vector<128x512xbf16>, vector<512x128xbf16>, vector<128x128xf32> -> vector<128x128xf32>
    %c0_9 = arith.constant 0 : index
    %c0_10 = arith.constant 0 : index
    %12 = vector.load %arg5[%c0_9, %c0_10] : memref<1x128xf32, #tpu.memory_space<vmem>>, vector<1x128xf32>
    %13 = vector.broadcast %12 : vector<1x128xf32> to vector<128x128xf32>
    %14 = arith.addf %11, %13 : vector<128x128xf32>
    %c0_11 = arith.constant 0 : index
    %c0_12 = arith.constant 0 : index
    %15 = vector.load %arg6[%c0_11, %c0_12] : memref<128x128xf32, #tpu.memory_space<vmem>>, vector<128x128xf32>
    tpu.vector_store %arg6[%c0_11, %c0_12], %14 {strides = array<i32>} : memref<128x128xf32, #tpu.memory_space<vmem>>, vector<128x128xf32>,
    return
  }
  func.func @transform_0(%arg0: i32) -> (i32, i32) {
    %c0_i32 = arith.constant 0 : i32
    %c0_i32_0 = arith.constant 0 : i32
    return %arg0, %c0_i32 : i32, i32
  }
  func.func @transform_1(%arg0: i32) -> (i32, i32) {
    %c0_i32 = arith.constant 0 : i32
    %c0_i32_0 = arith.constant 0 : i32
    %c0_i32_1 = arith.constant 0 : i32
    return %c0_i32, %c0_i32_0 : i32, i32
  }
  func.func @transform_2(%arg0: i32) -> (i32, i32) {
    %c0_i32 = arith.constant 0 : i32
    %c0_i32_0 = arith.constant 0 : i32
    %c0_i32_1 = arith.constant 0 : i32
    return %c0_i32, %c0_i32_0 : i32, i32
  }
  func.func @transform_3(%arg0: i32) -> (i32, i32) {
    %c0_i32 = arith.constant 0 : i32
    %c0_i32_0 = arith.constant 0 : i32
    %c0_i32_1 = arith.constant 0 : i32
    return %c0_i32, %c0_i32_0 : i32, i32
  }
  func.func @transform_4(%arg0: i32) -> (i32, i32) {
    %c0_i32 = arith.constant 0 : i32
    %c0_i32_0 = arith.constant 0 : i32
    %c0_i32_1 = arith.constant 0 : i32
    return %c0_i32, %c0_i32_0 : i32, i32
  }
  func.func @transform_5(%arg0: i32) -> (i32, i32) {
    %c0_i32 = arith.constant 0 : i32
    %c0_i32_0 = arith.constant 0 : i32
    return %arg0, %c0_i32 : i32, i32
  }
}

</mosaic_0001>

<bundles_post_ra>
// kernel: tpu_custom_call.1
= control target key start
LH: loop header
LB: loop body
LE: loop exit
PB: predicated region body
PF: predicated region fallthrough
CT: control target
= control target key end

     0   :  { %10 = vsyncpa [#allocation3], 0  ;;  %s1692_s0 = inlined_call_operand.hbm [shape: f32[128,128], index: 0, kind: input, shape index: {}]   ;;  %s1693_s1 = inlined_call_operand.hbm [shape: bf16[128,512], index: 1, kind: input, shape index: {}]   ;;  %s1694_s2 = inlined_call_operand.hbm [shape: f32[1,512], index: 2, kind: input, shape index: {}]   ;;  %s1695_s3 = inlined_call_operand.hbm [shape: bf16[512,128], index: 3, kind: input, shape index: {}]   ;;  %s1696_s4 = inlined_call_operand.vmem [shape: f32[1,128], index: 4, kind: input, shape index: {}]   ;;  %s1697_s5 = inlined_call_operand.hbm [shape: f32[128,128], index: 5, kind: output, shape index: {}]  }
   0x1   :  { %11 = vsyncpa [#allocation6], 0 }
   0x2   :  { %12 = vsyncpa [#allocation9], 0 }
   0x3   :  { %13 = vsyncpa [#allocation4], 0  ;;  %s1520_s18 = smov [#allocation5]  }
   0x4   :  { %s31_s19 = sshll.u32 %s1520_s18, 4  ;;  %s32_s19 = int_to_ptr.vmem [resolvable:$true] %s31_s19 }
   0x5   :  { %s1420_s20 = scalar_lea.vmem %s32_s19, 4096  ;;  %p1425_p1 = scmp.lt.s32.totalorder %s32_s19, %s32_s19 }
   0x6   :  { %p1421_p0 = scmp.ne.s32.totalorder %s32_s19, %s1420_s20  ;;  %p1426_p2 = scmp.lt.s32.totalorder %s1420_s20, %s1420_s20 }
   0x8   :  { %p1427_p3 = por %p1426_p2, %p1425_p1 }
   0xa   :  { %p1428_p4 = pnand %p1427_p3, %p1421_p0 }
   0xc   :  { %1431 = shalt.err (!%p1428_p4)
}
   0xd   :  { %s1521_s21 = smov 256   ;;  %s1522_s22 = smov 16  }
   0xe   :  { %37 = dma.hbm_to_vmem [thread:$0]  %s1693_s1, 4096, %s32_s19, [#allocation6], %s1521_s21, %s1521_s21, %s1522_s22  }
   0xf   :  { %s1523_s25 = smov [#allocation2]  }
  0x10   :  { %s19_s26 = sshll.u32 %s1523_s25, 4  ;;  %s20_s26 = int_to_ptr.vmem [resolvable:$true] %s19_s26 }
  0x11   :  { %s1440_s27 = scalar_lea.vmem %s20_s26, 2048  ;;  %p1445_p6 = scmp.lt.s32.totalorder %s20_s26, %s20_s26 }
  0x12   :  { %p1441_p5 = scmp.ne.s32.totalorder %s20_s26, %s1440_s27  ;;  %p1446_p7 = scmp.lt.s32.totalorder %s1440_s27, %s1440_s27 }
  0x14   :  { %p1447_p8 = por %p1446_p7, %p1445_p6 }
  0x16   :  { %p1448_p9 = pnand %p1447_p8, %p1441_p5 }
  0x18   :  { %1451 = shalt.err (!%p1448_p9)
}
  0x19   :  { %s1524_s28 = smov 128   ;;  %s1525_s29 = smov 8  }
  0x1a   :  { %25 = dma.hbm_to_vmem [thread:$0]  %s1692_s0, 2048, %s20_s26, [#allocation3], %s1524_s28, %s1524_s28, %s1525_s29  }
  0x1b   :  { %s1526_s1 = smov [#allocation7]   ;;  %s1527_s8 = smov [#allocation8]  }
  0x1c   :  { %s44_s7 = sshll.u32 %s1526_s1, 4  ;;  %s53_s9 = sshll.u32 %s1527_s8, 4  ;;  %s45_s7 = int_to_ptr.vmem [resolvable:$true] %s44_s7  ;;  %s54_s9 = int_to_ptr.vmem [resolvable:$true] %s53_s9 }
  0x1d   :  { %s1460_s10 = scalar_lea.vmem %s45_s7, 64  ;;  %p1465_p11 = scmp.lt.s32.totalorder %s45_s7, %s45_s7 }
  0x1e   :  { %p1461_p10 = scmp.ne.s32.totalorder %s45_s7, %s1460_s10  ;;  %p1466_p12 = scmp.lt.s32.totalorder %s1460_s10, %s1460_s10 }
  0x20   :  { %p1467_p13 = por %p1466_p12, %p1465_p11 }
  0x22   :  { %p1468_p0 = pnand %p1467_p13, %p1461_p10 }
  0x24   :  { %1471 = shalt.err (!%p1468_p0)
}
  0x25   :  { %47 = dma.hbm_to_vmem [thread:$0]  %s1694_s2, 64, %s45_s7, [#allocation6]  }
  0x26   :  { %s1480_s13 = scalar_lea.vmem %s54_s9, 4096  ;;  %p1485_p2 = scmp.lt.s32.totalorder %s54_s9, %s54_s9 }
  0x27   :  { %p1481_p1 = scmp.ne.s32.totalorder %s54_s9, %s1480_s13  ;;  %p1486_p3 = scmp.lt.s32.totalorder %s1480_s13, %s1480_s13 }
  0x29   :  { %p1487_p4 = por %p1486_p3, %p1485_p2 }
  0x2b   :  { %p1488_p5 = pnand %p1487_p4, %p1481_p1 }
  0x2d   :  { %1491 = shalt.err (!%p1488_p5)
}
  0x2e   :  { %s1528_s0 = smov 64   ;;  %s1529_s14 = smov 4  }
  0x2f   :  { %59 = dma.hbm_to_vmem [thread:$0]  %s1695_s3, 4096, %s54_s9, [#allocation9], %s1528_s0, %s1528_s0, %s1529_s14  }
  0x30   :  { %1512 = dma.done.wait [#allocation3], 2048  }
  0x31   :  { %1513 = vsyncadd [#allocation3], 4294965248 }
  0x32   :  { %1514 = dma.done.wait [#allocation6], 4160  }
  0x33   :  { %1515 = vsyncadd [#allocation6], 4294963136 }
  0x34   :  { %1516 = dma.done.wait [#allocation9], 4096  }
  0x35   :  { %1517 = vsyncadd [#allocation9], 4294963200  ;;  %v1530_v0 = vmov 0   ;;  %v1332_v1 = vld [vmem:[#allocation5 + $0xe4] ss:$16 sps:$4 sm:$0xff]   ;;  %v76_v34 = vld [vmem:[#allocation2 + $0x8] sm:$0xff] }
  0x36   :  { %345 = vmatprep.mubr.bf16.mxu0 %v1530_v0  ;;  %458 = vmatprep.mubr.bf16.mxu1 %v1530_v0  ;;  %v1334_v2 = vld [vmem:[#allocation5 + $0xec] ss:$16 sps:$4 sm:$0xff]   ;;  %v1336_v3 = vld [vmem:[#allocation5 + $0xe0] ss:$16 sps:$4 sm:$0xff]   ;;  %v1337_v4 = vld [vmem:[#allocation5 + $0xe8] ss:$16 sps:$4 sm:$0xff]  }
  0x37   :  { %313 = vmatprep.subr.bf16.mxu0 %v1332_v1  ;;  %426 = vmatprep.subr.bf16.mxu1 %v1334_v2  ;;  %v1338_v5 = vld [vmem:[#allocation5 + $0xc4] ss:$16 sps:$4 sm:$0xff]   ;;  %v1340_v6 = vld [vmem:[#allocation5 + $0xcc] ss:$16 sps:$4 sm:$0xff]   ;;  %v1342_v7 = vld [vmem:[#allocation5 + $0xc0] ss:$16 sps:$4 sm:$0xff]  }
  0x38   :  { %314 = vmatpush1.bf16.msra.mxu0 %v1336_v3  ;;  %427 = vmatpush1.bf16.msra.mxu1 %v1337_v4  ;;  %v1343_v8 = vld [vmem:[#allocation5 + $0xc8] ss:$16 sps:$4 sm:$0xff]   ;;  %v1344_v9 = vld [vmem:[#allocation5 + $0xa4] ss:$16 sps:$4 sm:$0xff]   ;;  %v1346_v10 = vld [vmem:[#allocation5 + $0xac] ss:$16 sps:$4 sm:$0xff]  }
  0x39   :  { %315 = vmatprep.subr.bf16.mxu0 %v1338_v5  ;;  %428 = vmatprep.subr.bf16.mxu1 %v1340_v6  ;;  %v1348_v11 = vld [vmem:[#allocation5 + $0xa0] ss:$16 sps:$4 sm:$0xff]   ;;  %v1349_v12 = vld [vmem:[#allocation5 + $0xa8] ss:$16 sps:$4 sm:$0xff]   ;;  %v1350_v13 = vld [vmem:[#allocation5 + $0x84] ss:$16 sps:$4 sm:$0xff]  }
  0x3a   :  { %v1352_v14 = vld [vmem:[#allocation5 + $0x8c] ss:$16 sps:$4 sm:$0xff]   ;;  %v1354_v15 = vld [vmem:[#allocation5 + $0x80] ss:$16 sps:$4 sm:$0xff]   ;;  %v1355_v16 = vld [vmem:[#allocation5 + $0x88] ss:$16 sps:$4 sm:$0xff]  }
  0x3b   :  { %v1356_v17 = vld [vmem:[#allocation5 + $0x64] ss:$16 sps:$4 sm:$0xff]   ;;  %v1358_v18 = vld [vmem:[#allocation5 + $0x6c] ss:$16 sps:$4 sm:$0xff]   ;;  %v1360_v19 = vld [vmem:[#allocation5 + $0x60] ss:$16 sps:$4 sm:$0xff]  }
  0x3c   :  { %316 = vmatpush1.bf16.msra.mxu0 %v1342_v7  ;;  %429 = vmatpush1.bf16.msra.mxu1 %v1343_v8  ;;  %v1361_v20 = vld [vmem:[#allocation5 + $0x68] ss:$16 sps:$4 sm:$0xff]   ;;  %v1362_v21 = vld [vmem:[#allocation5 + $0x44] ss:$16 sps:$4 sm:$0xff]   ;;  %v1364_v22 = vld [vmem:[#allocation5 + $0x4c] ss:$16 sps:$4 sm:$0xff]  }
  0x3d   :  { %317 = vmatprep.subr.bf16.mxu0 %v1344_v9  ;;  %430 = vmatprep.subr.bf16.mxu1 %v1346_v10  ;;  %v1366_v23 = vld [vmem:[#allocation5 + $0x40] ss:$16 sps:$4 sm:$0xff]   ;;  %v1367_v24 = vld [vmem:[#allocation5 + $0x48] ss:$16 sps:$4 sm:$0xff]   ;;  %v1368_v25 = vld [vmem:[#allocation5 + $0x24] ss:$16 sps:$4 sm:$0xff]  }
  0x3e   :  { %v1370_v26 = vld [vmem:[#allocation5 + $0x2c] ss:$16 sps:$4 sm:$0xff]   ;;  %v1372_v27 = vld [vmem:[#allocation5 + $0x20] ss:$16 sps:$4 sm:$0xff]   ;;  %v1373_v28 = vld [vmem:[#allocation5 + $0x28] ss:$16 sps:$4 sm:$0xff]  }
  0x3f   :  { %v1374_v29 = vld [vmem:[#allocation5 + $0x4] ss:$16 sps:$4 sm:$0xff]   ;;  %v1376_v30 = vld [vmem:[#allocation5 + $0xc] ss:$16 sps:$4 sm:$0xff]   ;;  %v1378_v31 = vld [vmem:[#allocation5] ss:$16 sps:$4 sm:$0xff]  }
  0x40   :  { %318 = vmatpush1.bf16.msra.mxu0 %v1348_v11  ;;  %431 = vmatpush1.bf16.msra.mxu1 %v1349_v12  ;;  %v1379_v32 = vld [vmem:[#allocation5 + $0x8] ss:$16 sps:$4 sm:$0xff]   ;;  %v75_v33 = vld [vmem:[#allocation2] sm:$0xff]  ;;  %v77_v41 = vld [vmem:[#allocation2 + $0x10] sm:$0xff] }
  0x41   :  { %319 = vmatprep.subr.bf16.mxu0 %v1350_v13  ;;  %432 = vmatprep.subr.bf16.mxu1 %v1352_v14  ;;  %v1380_v35 = vld [vmem:[#allocation8 + $0x78] sm:$0xff]   ;;  %v91_v37 = vpack.c.bf16 %v76_v34, %v75_v33  ;;  %v1384_v40 = vld [vmem:[#allocation8 + $0x70] sm:$0xff]   ;;  %v1388_v46 = vld [vmem:[#allocation8 + $0x68] sm:$0xff]  }
  0x42   :  { %v1382_v36 = vld [vmem:[#allocation8 + $0xf8] sm:$0xff]   ;;  %v1386_v43 = vld [vmem:[#allocation8 + $0xf0] sm:$0xff]   ;;  %v1390_v47 = vld [vmem:[#allocation8 + $0xe8] sm:$0xff]  }
  0x43   :  { %v1381_v38 = vld [vmem:[#allocation8 + $0x38] sm:$0xff]   ;;  %v1385_v44 = vld [vmem:[#allocation8 + $0x30] sm:$0xff]   ;;  %v1389_v49 = vld [vmem:[#allocation8 + $0x28] sm:$0xff]  }
  0x44   :  { %320 = vmatpush1.bf16.msra.mxu0 %v1354_v15  ;;  %433 = vmatpush1.bf16.msra.mxu1 %v1355_v16  ;;  %v1383_v39 = vld [vmem:[#allocation8 + $0xb8] sm:$0xff]   ;;  %v1387_v45 = vld [vmem:[#allocation8 + $0xb0] sm:$0xff]   ;;  %v1391_v50 = vld [vmem:[#allocation8 + $0xa8] sm:$0xff]  }
  0x45   :  { %321 = vmatprep.subr.bf16.mxu0 %v1356_v17  ;;  %434 = vmatprep.subr.bf16.mxu1 %v1358_v18  ;;  %v78_v42 = vld [vmem:[#allocation2 + $0x18] sm:$0xff]  ;;  %v1392_v51 = vld [vmem:[#allocation8 + $0x60] sm:$0xff]   ;;  %v81_v63 = vld [vmem:[#allocation2 + $0x30] sm:$0xff] }
  0x46   :  { %v92_v48 = vpack.c.bf16 %v78_v42, %v77_v41  ;;  %v79_v52 = vld [vmem:[#allocation2 + $0x20] sm:$0xff]  ;;  %v80_v53 = vld [vmem:[#allocation2 + $0x28] sm:$0xff]  ;;  %v1400_v62 = vld [vmem:[#allocation8 + $0x50] sm:$0xff]  }
  0x47   :  { %v1394_v54 = vld [vmem:[#allocation8 + $0xe0] sm:$0xff]   ;;  %v1396_v57 = vld [vmem:[#allocation8 + $0x58] sm:$0xff]   ;;  %v93_v59 = vpack.c.bf16 %v80_v53, %v79_v52  ;;  %v1402_v2 = vld [vmem:[#allocation8 + $0xd0] sm:$0xff]  }
  0x48   :  { %322 = vmatpush1.bf16.msra.mxu0 %v1360_v19  ;;  %435 = vmatpush1.bf16.msra.mxu1 %v1361_v20  ;;  %v1393_v55 = vld [vmem:[#allocation8 + $0x20] sm:$0xff]   ;;  %v1398_v58 = vld [vmem:[#allocation8 + $0xd8] sm:$0xff]   ;;  %v1401_v3 = vld [vmem:[#allocation8 + $0x10] sm:$0xff]  }
  0x49   :  { %323 = vmatprep.subr.bf16.mxu0 %v1362_v21  ;;  %436 = vmatprep.subr.bf16.mxu1 %v1364_v22  ;;  %v1395_v56 = vld [vmem:[#allocation8 + $0xa0] sm:$0xff]   ;;  %v1397_v60 = vld [vmem:[#allocation8 + $0x18] sm:$0xff]   ;;  %v1403_v4 = vld [vmem:[#allocation8 + $0x90] sm:$0xff]  }
  0x4a   :  { %v1399_v61 = vld [vmem:[#allocation8 + $0x98] sm:$0xff]   ;;  %v1404_v5 = vld [vmem:[#allocation8 + $0x48] sm:$0xff]   ;;  %v1408_v22 = vld [vmem:[#allocation8 + $0x40] sm:$0xff]  }
  0x4b   :  { %v82_v1 = vld [vmem:[#allocation2 + $0x38] sm:$0xff]  ;;  %v1406_v6 = vld [vmem:[#allocation8 + $0xc8] sm:$0xff]   ;;  %v83_v9 = vld [vmem:[#allocation2 + $0x40] sm:$0xff] }
  0x4c   :  { %324 = vmatpush1.bf16.msra.mxu0 %v1366_v23  ;;  %437 = vmatpush1.bf16.msra.mxu1 %v1367_v24  ;;  %v94_v7 = vpack.c.bf16 %v82_v1, %v81_v63  ;;  %v1405_v8 = vld [vmem:[#allocation8 + $0x8] sm:$0xff]   ;;  %v86_v13 = vld [vmem:[#allocation2 + $0x58] sm:$0xff]  ;;  %v87_v15 = vld [vmem:[#allocation2 + $0x60] sm:$0xff] }
  0x4d   :  { %325 = vmatprep.subr.bf16.mxu0 %v1368_v25  ;;  %438 = vmatprep.subr.bf16.mxu1 %v1370_v26  ;;  %v84_v10 = vld [vmem:[#allocation2 + $0x48] sm:$0xff]  ;;  %v85_v12 = vld [vmem:[#allocation2 + $0x50] sm:$0xff]  ;;  %v90_v19 = vld [vmem:[#allocation2 + $0x78] sm:$0xff]  ;;  %v133_v26 = vlaneseq }
  0x4e   :  { %v95_v11 = vpack.c.bf16 %v84_v10, %v83_v9  ;;  %v96_v14 = vpack.c.bf16 %v86_v13, %v85_v12  ;;  %v88_v16 = vld [vmem:[#allocation2 + $0x68] sm:$0xff]  ;;  %v89_v18 = vld [vmem:[#allocation2 + $0x70] sm:$0xff] }
  0x4f   :  { %v97_v17 = vpack.c.bf16 %v88_v16, %v87_v15  ;;  %v98_v20 = vpack.c.bf16 %v90_v19, %v89_v18  ;;  %v1407_v21 = vld [vmem:[#allocation8 + $0x88] sm:$0xff]   ;;  %v1410_v23 = vld [vmem:[#allocation8 + $0xc0] sm:$0xff]  }
  0x50   :  { %326 = vmatpush1.bf16.msra.mxu0 %v1372_v27  ;;  %439 = vmatpush1.bf16.msra.mxu1 %v1373_v28  ;;  %v1409_v24 = vld [vmem:[#allocation8] sm:$0xff]   ;;  %v134_v27 = vshrl.u32 %v133_v26, 7 }
  0x51   :  { %327 = vmatprep.subr.bf16.mxu0 %v1374_v29  ;;  %440 = vmatprep.subr.bf16.mxu1 %v1376_v30  ;;  %v1411_v25 = vld [vmem:[#allocation8 + $0x80] sm:$0xff]  }
  0x52   :  { %v139_v28 = vsub.s32 1, %v134_v27  ;;  %v147_v29 = vsub.s32 3, %v134_v27  ;;  %v143_v30 = vsub.s32 2, %v134_v27 }
  0x54   :  { %328 = vmatpush1.bf16.msra.mxu0 %v1378_v31  ;;  %441 = vmatpush1.bf16.msra.mxu1 %v1379_v32  ;;  %v131_v31 = vld [vmem:[#allocation7] sm:$0xf] }
  0x55   :  { %1192 = vmatprep.subr.bf16.mxu0 %v1380_v35  ;;  %1256 = vmatprep.subr.bf16.mxu1 %v1382_v36  ;;  %v1593_v34 = vrot.slane %v131_v31, %v139_v28  ;;  %v1595_v35 = vrot.slane %v131_v31, %v147_v29 }
  0x57   :  { %346 = vmatmul.mubr.bf16.vlgmr.msra.gmra.mxu0 %v91_v37  ;;  %459 = vmatmul.mubr.bf16.vlgmr.msra.gmra.mxu1 %v91_v37  ;;  %v1599_v37 = vrot.slane %v131_v31, %v143_v30 }
  0x58   :  { %355 = vmatprep.mubr.bf16.mxu0 %v1530_v0  ;;  %468 = vmatprep.mubr.bf16.mxu1 %v1530_v0 }
  0x59   :  { %1193 = vmatpush3.bf16.msra.mxu0 %v1381_v38  ;;  %1257 = vmatpush3.bf16.msra.mxu1 %v1383_v39 }
  0x5a   :  { %1194 = vmatprep.subr.bf16.mxu0 %v1384_v40  ;;  %1258 = vmatprep.subr.bf16.mxu1 %v1386_v43 }
  0x5d   :  { %1195 = vmatpush3.bf16.msra.mxu0 %v1385_v44  ;;  %1259 = vmatpush3.bf16.msra.mxu1 %v1387_v45 }
  0x5e   :  { %1196 = vmatprep.subr.bf16.mxu0 %v1388_v46  ;;  %1260 = vmatprep.subr.bf16.mxu1 %v1390_v47 }
  0x5f   :  { %356 = vmatmul.mubr.bf16.gmra.mxu0 %v92_v48  ;;  %469 = vmatmul.mubr.bf16.gmra.mxu1 %v92_v48 }
  0x60   :  { %365 = vmatprep.mubr.bf16.mxu0 %v1530_v0  ;;  %478 = vmatprep.mubr.bf16.mxu1 %v1530_v0 }
  0x61   :  { %1197 = vmatpush3.bf16.msra.mxu0 %v1389_v49  ;;  %1261 = vmatpush3.bf16.msra.mxu1 %v1391_v50 }
  0x62   :  { %1198 = vmatprep.subr.bf16.mxu0 %v1392_v51  ;;  %1262 = vmatprep.subr.bf16.mxu1 %v1394_v54 }
  0x65   :  { %1199 = vmatpush3.bf16.msra.mxu0 %v1393_v55  ;;  %1263 = vmatpush3.bf16.msra.mxu1 %v1395_v56 }
  0x66   :  { %1200 = vmatprep.subr.bf16.mxu0 %v1396_v57  ;;  %1264 = vmatprep.subr.bf16.mxu1 %v1398_v58 }
  0x67   :  { %366 = vmatmul.mubr.bf16.gmra.mxu0 %v93_v59  ;;  %479 = vmatmul.mubr.bf16.gmra.mxu1 %v93_v59 }
  0x68   :  { %375 = vmatprep.mubr.bf16.mxu0 %v1530_v0  ;;  %488 = vmatprep.mubr.bf16.mxu1 %v1530_v0 }
  0x69   :  { %1201 = vmatpush3.bf16.msra.mxu0 %v1397_v60  ;;  %1265 = vmatpush3.bf16.msra.mxu1 %v1399_v61 }
  0x6a   :  { %1202 = vmatprep.subr.bf16.mxu0 %v1400_v62  ;;  %1266 = vmatprep.subr.bf16.mxu1 %v1402_v2 }
  0x6d   :  { %1203 = vmatpush3.bf16.msra.mxu0 %v1401_v3  ;;  %1267 = vmatpush3.bf16.msra.mxu1 %v1403_v4 }
  0x6e   :  { %1204 = vmatprep.subr.bf16.mxu0 %v1404_v5  ;;  %1268 = vmatprep.subr.bf16.mxu1 %v1406_v6 }
  0x6f   :  { %376 = vmatmul.mubr.bf16.gmra.mxu0 %v94_v7  ;;  %489 = vmatmul.mubr.bf16.gmra.mxu1 %v94_v7 }
  0x70   :  { %385 = vmatprep.mubr.bf16.mxu0 %v1530_v0  ;;  %498 = vmatprep.mubr.bf16.mxu1 %v1530_v0 }
  0x71   :  { %1205 = vmatpush3.bf16.msra.mxu0 %v1405_v8  ;;  %1269 = vmatpush3.bf16.msra.mxu1 %v1407_v21 }
  0x72   :  { %1206 = vmatprep.subr.bf16.mxu0 %v1408_v22  ;;  %1270 = vmatprep.subr.bf16.mxu1 %v1410_v23 }
  0x75   :  { %1207 = vmatpush3.bf16.msra.mxu0 %v1409_v24  ;;  %1271 = vmatpush3.bf16.msra.mxu1 %v1411_v25 }
  0x77   :  { %386 = vmatmul.mubr.bf16.gmra.mxu0 %v95_v11  ;;  %499 = vmatmul.mubr.bf16.gmra.mxu1 %v95_v11 }
  0x78   :  { %395 = vmatprep.mubr.bf16.mxu0 %v1530_v0  ;;  %508 = vmatprep.mubr.bf16.mxu1 %v1530_v0 }
  0x7f   :  { %396 = vmatmul.mubr.bf16.gmra.mxu0 %v96_v14  ;;  %509 = vmatmul.mubr.bf16.gmra.mxu1 %v96_v14 }
  0x80   :  { %405 = vmatprep.mubr.bf16.mxu0 %v1530_v0  ;;  %518 = vmatprep.mubr.bf16.mxu1 %v1530_v0 }
  0x87   :  { %406 = vmatmul.mubr.bf16.gmra.mxu0 %v97_v17  ;;  %519 = vmatmul.mubr.bf16.gmra.mxu1 %v97_v17 }
  0x88   :  { %415 = vmatprep.mubr.bf16.mxu0 %v1530_v0  ;;  %528 = vmatprep.mubr.bf16.mxu1 %v1530_v0  ;;  %v135_v0 = vsub.s32 0, %v134_v27 }
  0x8a   :  { %v1597_v36 = vrot.slane %v131_v31, %v135_v0 }
  0x8f   :  { %416 = vmatmul.mubr.bf16.gmra.mxu0 %v98_v20  ;;  %529 = vmatmul.mubr.bf16.gmra.mxu1 %v98_v20 }
 0x117   :  { %v347_v32 = vpop.f32.mrf.mxu0  ;;  %v460_v33 = vpop.f32.mrf.mxu1 }
 0x118   :  { %v348_v46 = vadd.f32 %v347_v32, %v1597_v36  ;;  %v461_v47 = vadd.f32 %v460_v33, %v1599_v37 }
 0x119   :  { %v349_v38 = vpop.f32.mrf.mxu0  ;;  %v462_v39 = vpop.f32.mrf.mxu1 }
 0x11a   :  { %v350_v42 = vadd.f32 %v349_v38, %v1593_v34  ;;  %v463_v43 = vadd.f32 %v462_v39, %v1595_v35  ;;  %v539_v60 = vmax.f32 %v348_v46, 0.0  ;;  %v541_v61 = vmax.f32 %v461_v47, 0.0 }
 0x11b   :  { %v351_v40 = vpop.f32.mrf.mxu0  ;;  %v464_v41 = vpop.f32.mrf.mxu1 }
 0x11c   :  { %v352_v44 = vadd.f32 %v351_v40, %v1597_v36  ;;  %v465_v45 = vadd.f32 %v464_v41, %v1599_v37  ;;  %v540_v56 = vmax.f32 %v350_v42, 0.0  ;;  %v542_v57 = vmax.f32 %v463_v43, 0.0 }
 0x11d   :  { %v353_v48 = vpop.f32.mrf.mxu0  ;;  %v466_v49 = vpop.f32.mrf.mxu1 }
 0x11e   :  { %v354_v50 = vadd.f32 %v353_v48, %v1593_v34  ;;  %v467_v51 = vadd.f32 %v466_v49, %v1595_v35  ;;  %v543_v52 = vmax.f32 %v352_v44, 0.0  ;;  %v545_v53 = vmax.f32 %v465_v45, 0.0 }
 0x11f   :  { %v357_v54 = vpop.f32.mrf.mxu0  ;;  %v470_v55 = vpop.f32.mrf.mxu1 }
 0x120   :  { %v544_v58 = vmax.f32 %v354_v50, 0.0  ;;  %v546_v59 = vmax.f32 %v467_v51, 0.0  ;;  %v603_v3 = vpack.c.bf16 %v543_v52, %v539_v60  ;;  %v605_v4 = vpack.c.bf16 %v545_v53, %v541_v61 }
 0x121   :  { %v359_v62 = vpop.f32.mrf.mxu0  ;;  %v472_v63 = vpop.f32.mrf.mxu1  ;;  %v358_v11 = vadd.f32 %v357_v54, %v1597_v36  ;;  %v471_v12 = vadd.f32 %v470_v55, %v1599_v37 }
 0x122   :  { %v604_v1 = vpack.c.bf16 %v544_v58, %v540_v56  ;;  %v606_v2 = vpack.c.bf16 %v546_v59, %v542_v57  ;;  %v360_v5 = vadd.f32 %v359_v62, %v1593_v34  ;;  %v473_v8 = vadd.f32 %v472_v63, %v1595_v35 }
 0x123   :  { %v361_v6 = vpop.f32.mrf.mxu0  ;;  %v474_v7 = vpop.f32.mrf.mxu1  ;;  %v547_v25 = vmax.f32 %v358_v11, 0.0  ;;  %v549_v26 = vmax.f32 %v471_v12, 0.0 }
 0x124   :  { %v362_v9 = vadd.f32 %v361_v6, %v1597_v36  ;;  %v475_v10 = vadd.f32 %v474_v7, %v1599_v37  ;;  %930 = vmatprep.mubr.bf16.mxu0 %v604_v1  ;;  %1027 = vmatprep.mubr.bf16.mxu1 %v606_v2  ;;  %v548_v21 = vmax.f32 %v360_v5, 0.0  ;;  %v550_v22 = vmax.f32 %v473_v8, 0.0 }
 0x125   :  { %v363_v13 = vpop.f32.mrf.mxu0  ;;  %v476_v14 = vpop.f32.mrf.mxu1  ;;  %931 = vmatmul.mubr.bf16.vlgmr.msra.gmra.mxu0 %v603_v3  ;;  %1028 = vmatmul.mubr.bf16.vlgmr.msra.gmra.mxu1 %v605_v4 }
 0x126   :  { %v364_v15 = vadd.f32 %v363_v13, %v1593_v34  ;;  %v477_v16 = vadd.f32 %v476_v14, %v1595_v35  ;;  %v551_v17 = vmax.f32 %v362_v9, 0.0  ;;  %v553_v18 = vmax.f32 %v475_v10, 0.0 }
 0x127   :  { %v367_v19 = vpop.f32.mrf.mxu0  ;;  %v480_v20 = vpop.f32.mrf.mxu1 }
 0x128   :  { %v552_v23 = vmax.f32 %v364_v15, 0.0  ;;  %v554_v24 = vmax.f32 %v477_v16, 0.0  ;;  %v607_v30 = vpack.c.bf16 %v551_v17, %v547_v25  ;;  %v609_v31 = vpack.c.bf16 %v553_v18, %v549_v26 }
 0x129   :  { %v369_v27 = vpop.f32.mrf.mxu0  ;;  %v482_v28 = vpop.f32.mrf.mxu1  ;;  %v368_v42 = vadd.f32 %v367_v19, %v1597_v36  ;;  %v481_v43 = vadd.f32 %v480_v20, %v1599_v37 }
 0x12a   :  { %v608_v29 = vpack.c.bf16 %v552_v23, %v548_v21  ;;  %v610_v0 = vpack.c.bf16 %v554_v24, %v550_v22  ;;  %v370_v32 = vadd.f32 %v369_v27, %v1593_v34  ;;  %v483_v39 = vadd.f32 %v482_v28, %v1595_v35 }
 0x12b   :  { %v371_v33 = vpop.f32.mrf.mxu0  ;;  %v484_v38 = vpop.f32.mrf.mxu1  ;;  %v555_v56 = vmax.f32 %v368_v42, 0.0  ;;  %v557_v57 = vmax.f32 %v481_v43, 0.0 }
 0x12c   :  { %v372_v40 = vadd.f32 %v371_v33, %v1597_v36  ;;  %v485_v41 = vadd.f32 %v484_v38, %v1599_v37  ;;  %938 = vmatprep.mubr.bf16.mxu0 %v608_v29  ;;  %1035 = vmatprep.mubr.bf16.mxu1 %v610_v0  ;;  %v556_v52 = vmax.f32 %v370_v32, 0.0  ;;  %v558_v53 = vmax.f32 %v483_v39, 0.0 }
 0x12d   :  { %v373_v44 = vpop.f32.mrf.mxu0  ;;  %v486_v45 = vpop.f32.mrf.mxu1  ;;  %939 = vmatmul.mubr.bf16.gmra.mxu0 %v607_v30  ;;  %1036 = vmatmul.mubr.bf16.gmra.mxu1 %v609_v31 }
 0x12e   :  { %v374_v46 = vadd.f32 %v373_v44, %v1593_v34  ;;  %v487_v47 = vadd.f32 %v486_v45, %v1595_v35  ;;  %v559_v48 = vmax.f32 %v372_v40, 0.0  ;;  %v561_v49 = vmax.f32 %v485_v41, 0.0 }
 0x12f   :  { %v377_v50 = vpop.f32.mrf.mxu0  ;;  %v490_v51 = vpop.f32.mrf.mxu1 }
 0x130   :  { %v560_v54 = vmax.f32 %v374_v46, 0.0  ;;  %v562_v55 = vmax.f32 %v487_v47, 0.0  ;;  %v611_v62 = vpack.c.bf16 %v559_v48, %v555_v56  ;;  %v613_v63 = vpack.c.bf16 %v561_v49, %v557_v57 }
 0x131   :  { %v379_v58 = vpop.f32.mrf.mxu0  ;;  %v492_v59 = vpop.f32.mrf.mxu1  ;;  %v378_v7 = vadd.f32 %v377_v50, %v1597_v36  ;;  %v491_v8 = vadd.f32 %v490_v51, %v1599_v37 }
 0x132   :  { %v612_v60 = vpack.c.bf16 %v560_v54, %v556_v52  ;;  %v614_v61 = vpack.c.bf16 %v562_v55, %v558_v53  ;;  %v380_v1 = vadd.f32 %v379_v58, %v1593_v34  ;;  %v493_v4 = vadd.f32 %v492_v59, %v1595_v35 }
 0x133   :  { %v381_v2 = vpop.f32.mrf.mxu0  ;;  %v494_v3 = vpop.f32.mrf.mxu1  ;;  %v563_v21 = vmax.f32 %v378_v7, 0.0  ;;  %v565_v22 = vmax.f32 %v491_v8, 0.0 }
 0x134   :  { %v382_v5 = vadd.f32 %v381_v2, %v1597_v36  ;;  %v495_v6 = vadd.f32 %v494_v3, %v1599_v37  ;;  %946 = vmatprep.mubr.bf16.mxu0 %v612_v60  ;;  %1043 = vmatprep.mubr.bf16.mxu1 %v614_v61  ;;  %v564_v17 = vmax.f32 %v380_v1, 0.0  ;;  %v566_v18 = vmax.f32 %v493_v4, 0.0 }
 0x135   :  { %v383_v9 = vpop.f32.mrf.mxu0  ;;  %v496_v10 = vpop.f32.mrf.mxu1  ;;  %947 = vmatmul.mubr.bf16.gmra.mxu0 %v611_v62  ;;  %1044 = vmatmul.mubr.bf16.gmra.mxu1 %v613_v63 }
 0x136   :  { %v384_v11 = vadd.f32 %v383_v9, %v1593_v34  ;;  %v497_v12 = vadd.f32 %v496_v10, %v1595_v35  ;;  %v567_v13 = vmax.f32 %v382_v5, 0.0  ;;  %v569_v14 = vmax.f32 %v495_v6, 0.0 }
 0x137   :  { %v387_v15 = vpop.f32.mrf.mxu0  ;;  %v500_v16 = vpop.f32.mrf.mxu1 }
 0x138   :  { %v568_v19 = vmax.f32 %v384_v11, 0.0  ;;  %v570_v20 = vmax.f32 %v497_v12, 0.0  ;;  %v615_v27 = vpack.c.bf16 %v567_v13, %v563_v21  ;;  %v617_v28 = vpack.c.bf16 %v569_v14, %v565_v22 }
 0x139   :  { %v389_v23 = vpop.f32.mrf.mxu0  ;;  %v502_v24 = vpop.f32.mrf.mxu1  ;;  %v388_v38 = vadd.f32 %v387_v15, %v1597_v36  ;;  %v501_v39 = vadd.f32 %v500_v16, %v1599_v37 }
 0x13a   :  { %v616_v25 = vpack.c.bf16 %v568_v19, %v564_v17  ;;  %v618_v26 = vpack.c.bf16 %v570_v20, %v566_v18  ;;  %v390_v29 = vadd.f32 %v389_v23, %v1593_v34  ;;  %v503_v31 = vadd.f32 %v502_v24, %v1595_v35 }
 0x13b   :  { %v391_v0 = vpop.f32.mrf.mxu0  ;;  %v504_v30 = vpop.f32.mrf.mxu1  ;;  %v571_v52 = vmax.f32 %v388_v38, 0.0  ;;  %v573_v53 = vmax.f32 %v501_v39, 0.0 }
 0x13c   :  { %v392_v32 = vadd.f32 %v391_v0, %v1597_v36  ;;  %v505_v33 = vadd.f32 %v504_v30, %v1599_v37  ;;  %954 = vmatprep.mubr.bf16.mxu0 %v616_v25  ;;  %1051 = vmatprep.mubr.bf16.mxu1 %v618_v26  ;;  %v572_v48 = vmax.f32 %v390_v29, 0.0  ;;  %v574_v49 = vmax.f32 %v503_v31, 0.0 }
 0x13d   :  { %v393_v40 = vpop.f32.mrf.mxu0  ;;  %v506_v41 = vpop.f32.mrf.mxu1  ;;  %955 = vmatmul.mubr.bf16.gmra.mxu0 %v615_v27  ;;  %1052 = vmatmul.mubr.bf16.gmra.mxu1 %v617_v28 }
 0x13e   :  { %v394_v42 = vadd.f32 %v393_v40, %v1593_v34  ;;  %v507_v43 = vadd.f32 %v506_v41, %v1595_v35  ;;  %v575_v44 = vmax.f32 %v392_v32, 0.0  ;;  %v577_v45 = vmax.f32 %v505_v33, 0.0 }
 0x13f   :  { %v397_v46 = vpop.f32.mrf.mxu0  ;;  %v510_v47 = vpop.f32.mrf.mxu1 }
 0x140   :  { %v576_v50 = vmax.f32 %v394_v42, 0.0  ;;  %v578_v51 = vmax.f32 %v507_v43, 0.0  ;;  %v619_v58 = vpack.c.bf16 %v575_v44, %v571_v52  ;;  %v621_v59 = vpack.c.bf16 %v577_v45, %v573_v53 }
 0x141   :  { %v399_v54 = vpop.f32.mrf.mxu0  ;;  %v512_v55 = vpop.f32.mrf.mxu1  ;;  %v398_v3 = vadd.f32 %v397_v46, %v1597_v36  ;;  %v511_v4 = vadd.f32 %v510_v47, %v1599_v37 }
 0x142   :  { %v620_v56 = vpack.c.bf16 %v576_v50, %v572_v48  ;;  %v622_v57 = vpack.c.bf16 %v578_v51, %v574_v49  ;;  %v400_v60 = vadd.f32 %v399_v54, %v1593_v34  ;;  %v513_v63 = vadd.f32 %v512_v55, %v1595_v35 }
 0x143   :  { %v401_v61 = vpop.f32.mrf.mxu0  ;;  %v514_v62 = vpop.f32.mrf.mxu1  ;;  %v579_v17 = vmax.f32 %v398_v3, 0.0  ;;  %v581_v18 = vmax.f32 %v511_v4, 0.0 }
 0x144   :  { %v402_v1 = vadd.f32 %v401_v61, %v1597_v36  ;;  %v515_v2 = vadd.f32 %v514_v62, %v1599_v37  ;;  %962 = vmatprep.mubr.bf16.mxu0 %v620_v56  ;;  %1059 = vmatprep.mubr.bf16.mxu1 %v622_v57  ;;  %v580_v13 = vmax.f32 %v400_v60, 0.0  ;;  %v582_v14 = vmax.f32 %v513_v63, 0.0 }
 0x145   :  { %v403_v5 = vpop.f32.mrf.mxu0  ;;  %v516_v6 = vpop.f32.mrf.mxu1  ;;  %963 = vmatmul.mubr.bf16.gmra.mxu0 %v619_v58  ;;  %1060 = vmatmul.mubr.bf16.gmra.mxu1 %v621_v59 }
 0x146   :  { %v404_v7 = vadd.f32 %v403_v5, %v1593_v34  ;;  %v517_v8 = vadd.f32 %v516_v6, %v1595_v35  ;;  %v583_v9 = vmax.f32 %v402_v1, 0.0  ;;  %v585_v10 = vmax.f32 %v515_v2, 0.0 }
 0x147   :  { %v407_v11 = vpop.f32.mrf.mxu0  ;;  %v520_v12 = vpop.f32.mrf.mxu1 }
 0x148   :  { %v584_v15 = vmax.f32 %v404_v7, 0.0  ;;  %v586_v16 = vmax.f32 %v517_v8, 0.0  ;;  %v623_v23 = vpack.c.bf16 %v583_v9, %v579_v17  ;;  %v625_v24 = vpack.c.bf16 %v585_v10, %v581_v18 }
 0x149   :  { %v409_v19 = vpop.f32.mrf.mxu0  ;;  %v522_v20 = vpop.f32.mrf.mxu1  ;;  %v408_v30 = vadd.f32 %v407_v11, %v1597_v36  ;;  %v521_v31 = vadd.f32 %v520_v12, %v1599_v37 }
 0x14a   :  { %v624_v21 = vpack.c.bf16 %v584_v15, %v580_v13  ;;  %v626_v22 = vpack.c.bf16 %v586_v16, %v582_v14  ;;  %v410_v25 = vadd.f32 %v409_v19, %v1593_v34  ;;  %v523_v28 = vadd.f32 %v522_v20, %v1595_v35 }
 0x14b   :  { %v411_v26 = vpop.f32.mrf.mxu0  ;;  %v524_v27 = vpop.f32.mrf.mxu1  ;;  %v587_v48 = vmax.f32 %v408_v30, 0.0  ;;  %v589_v49 = vmax.f32 %v521_v31, 0.0 }
 0x14c   :  { %v412_v29 = vadd.f32 %v411_v26, %v1597_v36  ;;  %v525_v0 = vadd.f32 %v524_v27, %v1599_v37  ;;  %970 = vmatprep.mubr.bf16.mxu0 %v624_v21  ;;  %1067 = vmatprep.mubr.bf16.mxu1 %v626_v22  ;;  %v588_v44 = vmax.f32 %v410_v25, 0.0  ;;  %v590_v45 = vmax.f32 %v523_v28, 0.0 }
 0x14d   :  { %v413_v32 = vpop.f32.mrf.mxu0  ;;  %v526_v33 = vpop.f32.mrf.mxu1  ;;  %971 = vmatmul.mubr.bf16.gmra.mxu0 %v623_v23  ;;  %1068 = vmatmul.mubr.bf16.gmra.mxu1 %v625_v24 }
 0x14e   :  { %v414_v38 = vadd.f32 %v413_v32, %v1593_v34  ;;  %v527_v39 = vadd.f32 %v526_v33, %v1595_v35  ;;  %v591_v40 = vmax.f32 %v412_v29, 0.0  ;;  %v593_v41 = vmax.f32 %v525_v0, 0.0 }
 0x14f   :  { %v417_v42 = vpop.f32.mrf.mxu0  ;;  %v530_v43 = vpop.f32.mrf.mxu1 }
 0x150   :  { %v592_v46 = vmax.f32 %v414_v38, 0.0  ;;  %v594_v47 = vmax.f32 %v527_v39, 0.0  ;;  %v627_v54 = vpack.c.bf16 %v591_v40, %v587_v48  ;;  %v629_v55 = vpack.c.bf16 %v593_v41, %v589_v49 }
 0x151   :  { %v419_v50 = vpop.f32.mrf.mxu0  ;;  %v532_v51 = vpop.f32.mrf.mxu1  ;;  %v418_v62 = vadd.f32 %v417_v42, %v1597_v36  ;;  %v531_v63 = vadd.f32 %v530_v43, %v1599_v37 }
 0x152   :  { %v628_v52 = vpack.c.bf16 %v592_v46, %v588_v44  ;;  %v630_v53 = vpack.c.bf16 %v594_v47, %v590_v45  ;;  %v420_v56 = vadd.f32 %v419_v50, %v1593_v34  ;;  %v533_v59 = vadd.f32 %v532_v51, %v1595_v35 }
 0x153   :  { %v421_v57 = vpop.f32.mrf.mxu0  ;;  %v534_v58 = vpop.f32.mrf.mxu1  ;;  %v595_v11 = vmax.f32 %v418_v62, 0.0  ;;  %v597_v12 = vmax.f32 %v531_v63, 0.0 }
 0x154   :  { %v422_v60 = vadd.f32 %v421_v57, %v1597_v36  ;;  %v535_v61 = vadd.f32 %v534_v58, %v1599_v37  ;;  %978 = vmatprep.mubr.bf16.mxu0 %v628_v52  ;;  %1075 = vmatprep.mubr.bf16.mxu1 %v630_v53  ;;  %v596_v7 = vmax.f32 %v420_v56, 0.0  ;;  %v598_v8 = vmax.f32 %v533_v59, 0.0 }
 0x155   :  { %v423_v1 = vpop.f32.mrf.mxu0  ;;  %v536_v2 = vpop.f32.mrf.mxu1  ;;  %979 = vmatmul.mubr.bf16.gmra.mxu0 %v627_v54  ;;  %1076 = vmatmul.mubr.bf16.gmra.mxu1 %v629_v55 }
 0x156   :  { %v424_v3 = vadd.f32 %v423_v1, %v1593_v34  ;;  %v537_v4 = vadd.f32 %v536_v2, %v1595_v35  ;;  %v599_v5 = vmax.f32 %v422_v60, 0.0  ;;  %v601_v6 = vmax.f32 %v535_v61, 0.0  ;;  %v1668_v35 = vld [vmem:[%s1696_s4] ss:$0 sm:$0xff]  ;;  %s1531_s4 = smov [#allocation10]  }
 0x157   :  { %s1113_s17 = sshll.u32 %s1531_s4, 4  ;;  %s1114_s17 = int_to_ptr.vmem [resolvable:$true] %s1113_s17 }
 0x158   :  { %v600_v9 = vmax.f32 %v424_v3, 0.0  ;;  %v602_v10 = vmax.f32 %v537_v4, 0.0  ;;  %v631_v14 = vpack.c.bf16 %v599_v5, %v595_v11  ;;  %v633_v37 = vpack.c.bf16 %v601_v6, %v597_v12  ;;  %s1492_s18 = scalar_lea.vmem %s1114_s17, 2048  ;;  %p1497_p7 = scmp.lt.s32.totalorder %s1114_s17, %s1114_s17 }
 0x159   :  { %p1493_p6 = scmp.ne.s32.totalorder %s1114_s17, %s1492_s18  ;;  %p1498_p8 = scmp.lt.s32.totalorder %s1492_s18, %s1492_s18 }
 0x15a   :  { %v632_v13 = vpack.c.bf16 %v600_v9, %v596_v7  ;;  %v634_v36 = vpack.c.bf16 %v602_v10, %v598_v8 }
 0x15b   :  { %p1499_p9 = por %p1498_p8, %p1497_p7 }
 0x15c   :  { %986 = vmatprep.mubr.bf16.mxu0 %v632_v13  ;;  %1083 = vmatprep.mubr.bf16.mxu1 %v634_v36 }
 0x15d   :  { %987 = vmatmul.mubr.bf16.gmra.mxu0 %v631_v14  ;;  %1084 = vmatmul.mubr.bf16.gmra.mxu1 %v633_v37  ;;  %p1500_p10 = pnand %p1499_p9, %p1493_p6 }
 0x1e5   :  { %v1208_v15 = vpop.f32.mrf.mxu0  ;;  %v1272_v34 = vpop.f32.mrf.mxu1 }
 0x1e7   :  { %v1209_v16 = vpop.f32.mrf.mxu0  ;;  %v1273_v17 = vpop.f32.mrf.mxu1 }
 0x1e8   :  { %v1210_v18 = vadd.f32 %v1209_v16, %v1208_v15  ;;  %v1274_v22 = vadd.f32 %v1273_v17, %v1272_v34 }
 0x1e9   :  { %v1211_v19 = vpop.f32.mrf.mxu0  ;;  %v1275_v20 = vpop.f32.mrf.mxu1 }
 0x1ea   :  { %v933_v21 = vadd.f32 %v1210_v18, %v1668_v35 }
 0x1eb   :  { %v1212_v23 = vpop.f32.mrf.mxu0  ;;  %v1276_v24 = vpop.f32.mrf.mxu1 }
 0x1ec   :  { %v1030_v25 = vadd.f32 %v1274_v22, %v933_v21  ;;  %v1213_v26 = vadd.f32 %v1212_v23, %v1211_v19  ;;  %v1277_v0 = vadd.f32 %v1276_v24, %v1275_v20 }
 0x1ed   :  { %v1214_v27 = vpop.f32.mrf.mxu0  ;;  %v1278_v28 = vpop.f32.mrf.mxu1 }
 0x1ee   :  { %1092 = vst [vmem:[#allocation10] sm:$0xff] %v1030_v25  ;;  %v936_v29 = vadd.f32 %v1213_v26, %v1668_v35 }
 0x1ef   :  { %v1215_v30 = vpop.f32.mrf.mxu0  ;;  %v1279_v31 = vpop.f32.mrf.mxu1 }
 0x1f0   :  { %v1033_v32 = vadd.f32 %v1277_v0, %v936_v29  ;;  %v1216_v33 = vadd.f32 %v1215_v30, %v1214_v27  ;;  %v1280_v41 = vadd.f32 %v1279_v31, %v1278_v28 }
 0x1f1   :  { %v1217_v38 = vpop.f32.mrf.mxu0  ;;  %v1281_v39 = vpop.f32.mrf.mxu1 }
 0x1f2   :  { %1093 = vst [vmem:[#allocation10 + $0x8] sm:$0xff] %v1033_v32  ;;  %v941_v40 = vadd.f32 %v1216_v33, %v1668_v35 }
 0x1f3   :  { %v1218_v42 = vpop.f32.mrf.mxu0  ;;  %v1282_v43 = vpop.f32.mrf.mxu1 }
 0x1f4   :  { %v1038_v44 = vadd.f32 %v1280_v41, %v941_v40  ;;  %v1219_v45 = vadd.f32 %v1218_v42, %v1217_v38  ;;  %v1283_v49 = vadd.f32 %v1282_v43, %v1281_v39 }
 0x1f5   :  { %v1220_v46 = vpop.f32.mrf.mxu0  ;;  %v1284_v47 = vpop.f32.mrf.mxu1 }
 0x1f6   :  { %1094 = vst [vmem:[#allocation10 + $0x10] sm:$0xff] %v1038_v44  ;;  %v944_v48 = vadd.f32 %v1219_v45, %v1668_v35 }
 0x1f7   :  { %v1221_v50 = vpop.f32.mrf.mxu0  ;;  %v1285_v51 = vpop.f32.mrf.mxu1 }
 0x1f8   :  { %v1041_v52 = vadd.f32 %v1283_v49, %v944_v48  ;;  %v1222_v53 = vadd.f32 %v1221_v50, %v1220_v46  ;;  %v1286_v57 = vadd.f32 %v1285_v51, %v1284_v47 }
 0x1f9   :  { %v1223_v54 = vpop.f32.mrf.mxu0  ;;  %v1287_v55 = vpop.f32.mrf.mxu1 }
 0x1fa   :  { %1095 = vst [vmem:[#allocation10 + $0x18] sm:$0xff] %v1041_v52  ;;  %v949_v56 = vadd.f32 %v1222_v53, %v1668_v35 }
 0x1fb   :  { %v1224_v58 = vpop.f32.mrf.mxu0  ;;  %v1288_v59 = vpop.f32.mrf.mxu1 }
 0x1fc   :  { %v1046_v60 = vadd.f32 %v1286_v57, %v949_v56  ;;  %v1225_v61 = vadd.f32 %v1224_v58, %v1223_v54  ;;  %v1289_v2 = vadd.f32 %v1288_v59, %v1287_v55 }
 0x1fd   :  { %v1226_v62 = vpop.f32.mrf.mxu0  ;;  %v1290_v63 = vpop.f32.mrf.mxu1 }
 0x1fe   :  { %1096 = vst [vmem:[#allocation10 + $0x20] sm:$0xff] %v1046_v60  ;;  %v952_v1 = vadd.f32 %v1225_v61, %v1668_v35 }
 0x1ff   :  { %v1227_v3 = vpop.f32.mrf.mxu0  ;;  %v1291_v4 = vpop.f32.mrf.mxu1 }
 0x200   :  { %v1049_v5 = vadd.f32 %v1289_v2, %v952_v1  ;;  %v1228_v6 = vadd.f32 %v1227_v3, %v1226_v62  ;;  %v1292_v10 = vadd.f32 %v1291_v4, %v1290_v63 }
 0x201   :  { %v1229_v7 = vpop.f32.mrf.mxu0  ;;  %v1293_v8 = vpop.f32.mrf.mxu1 }
 0x202   :  { %1097 = vst [vmem:[#allocation10 + $0x28] sm:$0xff] %v1049_v5  ;;  %v957_v9 = vadd.f32 %v1228_v6, %v1668_v35 }
 0x203   :  { %v1230_v11 = vpop.f32.mrf.mxu0  ;;  %v1294_v12 = vpop.f32.mrf.mxu1 }
 0x204   :  { %v1054_v13 = vadd.f32 %v1292_v10, %v957_v9  ;;  %v1231_v36 = vadd.f32 %v1230_v11, %v1229_v7  ;;  %v1295_v34 = vadd.f32 %v1294_v12, %v1293_v8 }
 0x205   :  { %v1232_v14 = vpop.f32.mrf.mxu0  ;;  %v1296_v37 = vpop.f32.mrf.mxu1 }
 0x206   :  { %1098 = vst [vmem:[#allocation10 + $0x30] sm:$0xff] %v1054_v13  ;;  %v960_v15 = vadd.f32 %v1231_v36, %v1668_v35 }
 0x207   :  { %v1233_v16 = vpop.f32.mrf.mxu0  ;;  %v1297_v17 = vpop.f32.mrf.mxu1 }
 0x208   :  { %v1057_v18 = vadd.f32 %v1295_v34, %v960_v15  ;;  %v1234_v19 = vadd.f32 %v1233_v16, %v1232_v14  ;;  %v1298_v23 = vadd.f32 %v1297_v17, %v1296_v37 }
 0x209   :  { %v1235_v20 = vpop.f32.mrf.mxu0  ;;  %v1299_v21 = vpop.f32.mrf.mxu1 }
 0x20a   :  { %1099 = vst [vmem:[#allocation10 + $0x38] sm:$0xff] %v1057_v18  ;;  %v965_v22 = vadd.f32 %v1234_v19, %v1668_v35 }
 0x20b   :  { %v1236_v24 = vpop.f32.mrf.mxu0  ;;  %v1300_v25 = vpop.f32.mrf.mxu1 }
 0x20c   :  { %v1062_v26 = vadd.f32 %v1298_v23, %v965_v22  ;;  %v1237_v27 = vadd.f32 %v1236_v24, %v1235_v20  ;;  %v1301_v30 = vadd.f32 %v1300_v25, %v1299_v21 }
 0x20d   :  { %v1238_v28 = vpop.f32.mrf.mxu0  ;;  %v1302_v29 = vpop.f32.mrf.mxu1 }
 0x20e   :  { %1100 = vst [vmem:[#allocation10 + $0x40] sm:$0xff] %v1062_v26  ;;  %v968_v0 = vadd.f32 %v1237_v27, %v1668_v35 }
 0x20f   :  { %v1239_v31 = vpop.f32.mrf.mxu0  ;;  %v1303_v32 = vpop.f32.mrf.mxu1 }
 0x210   :  { %v1065_v33 = vadd.f32 %v1301_v30, %v968_v0  ;;  %v1240_v38 = vadd.f32 %v1239_v31, %v1238_v28  ;;  %v1304_v42 = vadd.f32 %v1303_v32, %v1302_v29 }
 0x211   :  { %v1241_v39 = vpop.f32.mrf.mxu0  ;;  %v1305_v40 = vpop.f32.mrf.mxu1 }
 0x212   :  { %1101 = vst [vmem:[#allocation10 + $0x48] sm:$0xff] %v1065_v33  ;;  %v973_v41 = vadd.f32 %v1240_v38, %v1668_v35 }
 0x213   :  { %v1242_v43 = vpop.f32.mrf.mxu0  ;;  %v1306_v44 = vpop.f32.mrf.mxu1 }
 0x214   :  { %v1070_v45 = vadd.f32 %v1304_v42, %v973_v41  ;;  %v1243_v46 = vadd.f32 %v1242_v43, %v1241_v39  ;;  %v1307_v50 = vadd.f32 %v1306_v44, %v1305_v40 }
 0x215   :  { %v1244_v47 = vpop.f32.mrf.mxu0  ;;  %v1308_v48 = vpop.f32.mrf.mxu1 }
 0x216   :  { %1102 = vst [vmem:[#allocation10 + $0x50] sm:$0xff] %v1070_v45  ;;  %v976_v49 = vadd.f32 %v1243_v46, %v1668_v35 }
 0x217   :  { %v1245_v51 = vpop.f32.mrf.mxu0  ;;  %v1309_v52 = vpop.f32.mrf.mxu1 }
 0x218   :  { %v1073_v53 = vadd.f32 %v1307_v50, %v976_v49  ;;  %v1246_v54 = vadd.f32 %v1245_v51, %v1244_v47  ;;  %v1310_v58 = vadd.f32 %v1309_v52, %v1308_v48 }
 0x219   :  { %v1247_v55 = vpop.f32.mrf.mxu0  ;;  %v1311_v56 = vpop.f32.mrf.mxu1 }
 0x21a   :  { %1103 = vst [vmem:[#allocation10 + $0x58] sm:$0xff] %v1073_v53  ;;  %v981_v57 = vadd.f32 %v1246_v54, %v1668_v35 }
 0x21b   :  { %v1248_v59 = vpop.f32.mrf.mxu0  ;;  %v1312_v60 = vpop.f32.mrf.mxu1 }
 0x21c   :  { %v1078_v61 = vadd.f32 %v1310_v58, %v981_v57  ;;  %v1249_v62 = vadd.f32 %v1248_v59, %v1247_v55  ;;  %v1313_v3 = vadd.f32 %v1312_v60, %v1311_v56 }
 0x21d   :  { %v1250_v63 = vpop.f32.mrf.mxu0  ;;  %v1314_v1 = vpop.f32.mrf.mxu1 }
 0x21e   :  { %1104 = vst [vmem:[#allocation10 + $0x60] sm:$0xff] %v1078_v61  ;;  %v984_v2 = vadd.f32 %v1249_v62, %v1668_v35 }
 0x21f   :  { %v1251_v4 = vpop.f32.mrf.mxu0  ;;  %v1315_v5 = vpop.f32.mrf.mxu1 }
 0x220   :  { %v1081_v6 = vadd.f32 %v1313_v3, %v984_v2  ;;  %v1252_v7 = vadd.f32 %v1251_v4, %v1250_v63  ;;  %v1316_v11 = vadd.f32 %v1315_v5, %v1314_v1 }
 0x221   :  { %v1253_v8 = vpop.f32.mrf.mxu0  ;;  %v1317_v9 = vpop.f32.mrf.mxu1 }
 0x222   :  { %1105 = vst [vmem:[#allocation10 + $0x68] sm:$0xff] %v1081_v6  ;;  %v989_v10 = vadd.f32 %v1252_v7, %v1668_v35 }
 0x223   :  { %v1254_v12 = vpop.f32.mrf.mxu0  ;;  %v1318_v13 = vpop.f32.mrf.mxu1 }
 0x224   :  { %v1086_v36 = vadd.f32 %v1316_v11, %v989_v10  ;;  %v1255_v14 = vadd.f32 %v1254_v12, %v1253_v8  ;;  %v1319_v15 = vadd.f32 %v1318_v13, %v1317_v9 }
 0x226   :  { %1106 = vst [vmem:[#allocation10 + $0x70] sm:$0xff] %v1086_v36  ;;  %v992_v37 = vadd.f32 %v1255_v14, %v1668_v35 }
 0x228   :  { %v1089_v34 = vadd.f32 %v1319_v15, %v992_v37 }
 0x22a   :  { %1107 = vst [vmem:[#allocation10 + $0x78] sm:$0xff] %v1089_v34 }
 0x22b   :  { %1503 = shalt.err (!%p1500_p10)
}
 0x22c   :  { %1119 = dma.vmem_to_hbm [thread:$0]  %s1114_s17, 2048, %s1697_s5, [#allocation4], %s1524_s28, %s1524_s28, %s1525_s29  }
 0x22d   :  { %1518 = dma.done.wait [#allocation4], 2048  }
 0x22e   :  { %1519 = vsyncadd [#allocation4], 4294965248 }
 0x22f   :  { %1123 = vsyncpa [#allocation3], 1 }
 0x230   :  { %1124 = vsyncpa [#allocation6], 1 }
 0x231   :  { %1125 = vsyncpa [#allocation9], 1 }
 0x232   :  { %1126 = vsyncpa [#allocation4], 1 }

</bundles_post_ra>
